<compile_context>
chip_gen: v7x
topology: tpu7x:2x2x1
jax: 0.10.0
libtpu: 0.0.40
codegen_flags: <defaults>
</compile_context>

<pallas_src>
import jax
import jax.numpy as jnp
from jax.experimental import pallas as pl
from jax.experimental.pallas import tpu as pltpu

IN_DIM = 28 * 28      # 784
ENC_DIM = 32          # encoding_dim
MAX_TILE_B = 1024     # batch-tile upper bound (multiple of 8)


def _round_up(x, m):
    return (x + m - 1) // m * m


def autoencoder_kernel(x_ref, w1_ref, b1_ref, w2_ref, b2_ref, o_ref):
    # fc1: (tb, 784) @ (784, 32) on the MXU, f32 accumulation.
    h = jnp.dot(x_ref[...], w1_ref[...], preferred_element_type=jnp.float32)
    # bias + ReLU on the VPU (f32).
    h = jnp.maximum(h + b1_ref[...], 0.0)
    # fc2: (tb, 32) @ (32, 784) on the MXU, f32 accumulation.
    y = jnp.dot(h, w2_ref[...], preferred_element_type=jnp.float32)
    y = y + b2_ref[...]
    # sigmoid(y) = 1 / (1 + exp(-y)); exp and approx reciprocal both use the
    # EUP slot (free relative to the VPU/memory bottleneck).
    e = jnp.exp(-y)
    o_ref[...] = pl.reciprocal(1.0 + e, approx=True).astype(o_ref.dtype)


def autoencoder_forward(x, w1_t, b1, w2_t, b2, *, tile_b=MAX_TILE_B,
                        out_dtype=None):
    """Forward pass of the Autoencoder.

    x: (B, 784); w1_t: (784, 32) (fc1 weight pre-transposed to (in, out));
    b1: (32,); w2_t: (32, 784); b2: (784,).
    Returns (B, 784) in out_dtype (default: x.dtype).  out_dtype=jnp.bfloat16
    halves the output store bytes; x is never cast or copied in the wrapper.
    """
    B = x.shape[0]
    out_dtype = jnp.dtype(x.dtype if out_dtype is None else out_dtype)

    b1_r = jnp.reshape(b1, (1, ENC_DIM)).astype(jnp.float32)
    b2_r = jnp.reshape(b2, (1, IN_DIM)).astype(jnp.float32)

    # Batch tile: multiple of 8; when B permits, small enough that the grid
    # has >= 2 steps so ("parallel",) can shard across v7x's 2 TensorCores.
    if B <= 16:
        tb = _round_up(B, 8)
    else:
        tb = min(_round_up(tile_b, 8), _round_up(pl.cdiv(B, 2), 8))
    grid = (pl.cdiv(B, tb),)

    # Right-size the scoped VMEM limit from the actual buffers: double-buffered
    # x and out tiles, resident weights/biases, f32 intermediates + headroom.
    x_bytes = 2 * tb * IN_DIM * x.dtype.itemsize
    o_bytes = 2 * tb * IN_DIM * out_dtype.itemsize
    w_bytes = 2 * 2 * IN_DIM * ENC_DIM * w1_t.dtype.itemsize \
        + 2 * (IN_DIM + ENC_DIM) * 4
    tmp_bytes = 3 * tb * IN_DIM * 4
    vmem_limit = min(int(x_bytes + o_bytes + w_bytes + tmp_bytes + (16 << 20)),
                     56 << 20)

    return pl.pallas_call(
        autoencoder_kernel,
        out_shape=jax.ShapeDtypeStruct((B, IN_DIM), out_dtype),
        grid=grid,
        in_specs=[
            pl.BlockSpec((tb, IN_DIM), lambda i: (i, 0)),       # x: tiled over batch
            pl.BlockSpec((IN_DIM, ENC_DIM), lambda i: (0, 0)),  # w1: VMEM-resident
            pl.BlockSpec((1, ENC_DIM), lambda i: (0, 0)),       # b1: VMEM-resident
            pl.BlockSpec((ENC_DIM, IN_DIM), lambda i: (0, 0)),  # w2: VMEM-resident
            pl.BlockSpec((1, IN_DIM), lambda i: (0, 0)),        # b2: VMEM-resident
        ],
        out_specs=pl.BlockSpec((tb, IN_DIM), lambda i: (i, 0)),
        compiler_params=pltpu.CompilerParams(
            dimension_semantics=("parallel",),
            vmem_limit_bytes=vmem_limit,
        ),
    )(x, w1_t, b1_r, w2_t, b2_r)


def reference_forward(x, w1_t, b1, w2_t, b2):
    h = jnp.maximum(x @ w1_t + jnp.reshape(b1, (1, ENC_DIM)), 0.0)
    return jax.nn.sigmoid(h @ w2_t + jnp.reshape(b2, (1, IN_DIM)))


def init_params(key):
    # nn.Linear-style uniform(-1/sqrt(fan_in), +1/sqrt(fan_in)); weights are
    # stored pre-transposed as (in_features, out_features) so both matmuls map
    # directly onto the MXU without an in-kernel transpose.
    k1, k2, k3, k4 = jax.random.split(key, 4)
    bound1 = 1.0 / (IN_DIM ** 0.5)
    bound2 = 1.0 / (ENC_DIM ** 0.5)
    w1_t = jax.random.uniform(k1, (IN_DIM, ENC_DIM), jnp.float32, -bound1, bound1)
    b1 = jax.random.uniform(k2, (ENC_DIM,), jnp.float32, -bound1, bound1)
    w2_t = jax.random.uniform(k3, (ENC_DIM, IN_DIM), jnp.float32, -bound2, bound2)
    b2 = jax.random.uniform(k4, (IN_DIM,), jnp.float32, -bound2, bound2)
    return w1_t, b1, w2_t, b2


if __name__ == "__main__":
    key = jax.random.PRNGKey(0)
    kx, kx2, kp = jax.random.split(key, 3)
    w1_t, b1, w2_t, b2 = init_params(kp)

    # Small batch: single full tile.
    B = 8
    x = jax.random.uniform(kx, (B, IN_DIM), jnp.float32)
    ref = reference_forward(x, w1_t, b1, w2_t, b2)
    out = jax.block_until_ready(autoencoder_forward(x, w1_t, b1, w2_t, b2))
    assert out.shape == (B, IN_DIM)
    assert jnp.allclose(out, ref, atol=1e-2, rtol=1e-2), \
        float(jnp.max(jnp.abs(out - ref)))

    # Batch not a multiple of the tile: exercises the partial last block
    # (out-of-bounds rows are masked on store, never returned).
    B2 = 24
    x2 = jax.random.uniform(kx2, (B2, IN_DIM), jnp.float32)
    ref2 = reference_forward(x2, w1_t, b1, w2_t, b2)
    out2 = jax.block_until_ready(autoencoder_forward(x2, w1_t, b1, w2_t, b2))
    assert out2.shape == (B2, IN_DIM)
    assert jnp.allclose(out2, ref2, atol=1e-2, rtol=1e-2), \
        float(jnp.max(jnp.abs(out2 - ref2)))

    # bf16-output path (halves the store bytes of the dominant tensor).
    out_bf16 = jax.block_until_ready(
        autoencoder_forward(x, w1_t, b1, w2_t, b2, out_dtype=jnp.bfloat16))
    assert out_bf16.dtype == jnp.bfloat16
    assert jnp.allclose(out_bf16.astype(jnp.float32), ref, atol=3e-2), \
        float(jnp.max(jnp.abs(out_bf16.astype(jnp.float32) - ref)))

    print("KERNEL_OK")
</pallas_src>

<mosaic_0001>
module attributes {stable_mosaic.version = 11 : i64} {
  func.func @autoencoder_kernel(%arg0: i32, %arg1: memref<8x784xf32, #tpu.memory_space<vmem>>, %arg2: memref<784x32xf32, #tpu.memory_space<vmem>>, %arg3: memref<1x32xf32, #tpu.memory_space<vmem>>, %arg4: memref<32x784xf32, #tpu.memory_space<vmem>>, %arg5: memref<1x784xf32, #tpu.memory_space<vmem>>, %arg6: memref<8x784xf32, #tpu.memory_space<vmem>>) attributes {dimension_semantics = [#tpu.dimension_semantics<parallel>], iteration_bounds = array<i64: 1>, scalar_prefetch = 0 : i64, scratch_operands = 0 : i64, tpu.core_type = #tpu.core_type<tc>, window_params = [{transform_indices = @transform_0, window_bounds = array<i64: 8, 784>}, {pipeline_mode = #tpu.pipeline_mode<synchronous>, transform_indices = @transform_1, window_bounds = array<i64: 784, 32>}, {pipeline_mode = #tpu.pipeline_mode<synchronous>, transform_indices = @transform_2, window_bounds = array<i64: 1, 32>}, {pipeline_mode = #tpu.pipeline_mode<synchronous>, transform_indices = @transform_3, window_bounds = array<i64: 32, 784>}, {pipeline_mode = #tpu.pipeline_mode<synchronous>, transform_indices = @transform_4, window_bounds = array<i64: 1, 784>}, {transform_indices = @transform_5, window_bounds = array<i64: 8, 784>}]} {
    %c0 = arith.constant 0 : index
    %c0_0 = arith.constant 0 : index
    %0 = vector.load %arg1[%c0, %c0_0] : memref<8x784xf32, #tpu.memory_space<vmem>>, vector<8x784xf32>
    %c0_1 = arith.constant 0 : index
    %c0_2 = arith.constant 0 : index
    %1 = vector.load %arg2[%c0_1, %c0_2] : memref<784x32xf32, #tpu.memory_space<vmem>>, vector<784x32xf32>
    %cst = arith.constant dense<0.000000e+00> : vector<8x32xf32>
    %2 = tpu.matmul %0, %1, %cst {dimension_numbers = #tpu.dot_dimension_numbers<[1], [0], [0], [1], [0, 0, 1, 1], [], []>} : vector<8x784xf32>, vector<784x32xf32>, vector<8x32xf32> -> vector<8x32xf32>
    %c0_3 = arith.constant 0 : index
    %c0_4 = arith.constant 0 : index
    %3 = vector.load %arg3[%c0_3, %c0_4] : memref<1x32xf32, #tpu.memory_space<vmem>>, vector<1x32xf32>
    %4 = vector.broadcast %3 : vector<1x32xf32> to vector<8x32xf32>
    %5 = arith.addf %2, %4 : vector<8x32xf32>
    %cst_5 = arith.constant 0.000000e+00 : f32
    %6 = vector.broadcast %cst_5 : f32 to vector<8x32xf32>
    %7 = arith.maximumf %5, %6 : vector<8x32xf32>
    %c0_6 = arith.constant 0 : index
    %c0_7 = arith.constant 0 : index
    %8 = vector.load %arg4[%c0_6, %c0_7] : memref<32x784xf32, #tpu.memory_space<vmem>>, vector<32x784xf32>
    %cst_8 = arith.constant dense<0.000000e+00> : vector<8x784xf32>
    %9 = tpu.matmul %7, %8, %cst_8 {dimension_numbers = #tpu.dot_dimension_numbers<[1], [0], [0], [1], [0, 0, 1, 1], [], []>} : vector<8x32xf32>, vector<32x784xf32>, vector<8x784xf32> -> vector<8x784xf32>
    %c0_9 = arith.constant 0 : index
    %c0_10 = arith.constant 0 : index
    %10 = vector.load %arg5[%c0_9, %c0_10] : memref<1x784xf32, #tpu.memory_space<vmem>>, vector<1x784xf32>
    %11 = vector.broadcast %10 : vector<1x784xf32> to vector<8x784xf32>
    %12 = arith.addf %9, %11 : vector<8x784xf32>
    %cst_11 = arith.constant 0.000000e+00 : f32
    %13 = vector.broadcast %cst_11 : f32 to vector<8x784xf32>
    %14 = arith.subf %13, %12 : vector<8x784xf32>
    %15 = math.exp %14 : vector<8x784xf32>
    %cst_12 = arith.constant 1.000000e+00 : f32
    %16 = vector.broadcast %cst_12 : f32 to vector<8x784xf32>
    %17 = arith.addf %16, %15 : vector<8x784xf32>
    %18 = tpu.reciprocal %17 {approx = true} : vector<8x784xf32> -> vector<8x784xf32>
    %c0_13 = arith.constant 0 : index
    %c0_14 = arith.constant 0 : index
    %19 = vector.load %arg6[%c0_13, %c0_14] : memref<8x784xf32, #tpu.memory_space<vmem>>, vector<8x784xf32>
    tpu.vector_store %arg6[%c0_13, %c0_14], %18 {strides = array<i32>} : memref<8x784xf32, #tpu.memory_space<vmem>>, vector<8x784xf32>,
    return
  }
  func.func @transform_0(%arg0: i32) -> (i32, i32) {
    %c0_i32 = arith.constant 0 : i32
    %c0_i32_0 = arith.constant 0 : i32
    return %arg0, %c0_i32 : i32, i32
  }
  func.func @transform_1(%arg0: i32) -> (i32, i32) {
    %c0_i32 = arith.constant 0 : i32
    %c0_i32_0 = arith.constant 0 : i32
    %c0_i32_1 = arith.constant 0 : i32
    return %c0_i32, %c0_i32_0 : i32, i32
  }
  func.func @transform_2(%arg0: i32) -> (i32, i32) {
    %c0_i32 = arith.constant 0 : i32
    %c0_i32_0 = arith.constant 0 : i32
    %c0_i32_1 = arith.constant 0 : i32
    return %c0_i32, %c0_i32_0 : i32, i32
  }
  func.func @transform_3(%arg0: i32) -> (i32, i32) {
    %c0_i32 = arith.constant 0 : i32
    %c0_i32_0 = arith.constant 0 : i32
    %c0_i32_1 = arith.constant 0 : i32
    return %c0_i32, %c0_i32_0 : i32, i32
  }
  func.func @transform_4(%arg0: i32) -> (i32, i32) {
    %c0_i32 = arith.constant 0 : i32
    %c0_i32_0 = arith.constant 0 : i32
    %c0_i32_1 = arith.constant 0 : i32
    return %c0_i32, %c0_i32_0 : i32, i32
  }
  func.func @transform_5(%arg0: i32) -> (i32, i32) {
    %c0_i32 = arith.constant 0 : i32
    %c0_i32_0 = arith.constant 0 : i32
    return %arg0, %c0_i32 : i32, i32
  }
}

</mosaic_0001>

<bundles_post_ra>
// kernel: tpu_custom_call.1
= control target key start
LH: loop header
LB: loop body
LE: loop exit
PB: predicated region body
PF: predicated region fallthrough
CT: control target
= control target key end

     0   :  { %s1615_s0 = inlined_call_operand.vmem [shape: f32[8,784], index: 0, kind: input, shape index: {}]   ;;  %s1616_s1 = inlined_call_operand.vmem [shape: f32[784,32], index: 1, kind: input, shape index: {}]   ;;  %s1617_s2 = inlined_call_operand.vmem [shape: f32[1,32], index: 2, kind: input, shape index: {}]   ;;  %s1618_s3 = inlined_call_operand.vmem [shape: f32[32,784], index: 3, kind: input, shape index: {}]   ;;  %s1619_s4 = inlined_call_operand.vmem [shape: f32[1,784], index: 4, kind: input, shape index: {}]   ;;  %s1620_s5 = inlined_call_operand.hbm [shape: f32[8,784], index: 5, kind: output, shape index: {}]  }
   0x1   :  { %v44_v0 = vld [vmem:[%s1616_s1 + $0x80] sm:$0xff]  ;;  %v45_v1 = vld [vmem:[%s1616_s1 + $0x88] sm:$0xff]  ;;  %v46_v11 = vld [vmem:[%s1616_s1 + $0x90] sm:$0xff] }
   0x2   :  { %v28_v2 = vld [vmem:[%s1616_s1] sm:$0xff]  ;;  %v963_v3 = vpack.c.bf16 %v45_v1, %v44_v0  ;;  %v29_v4 = vld [vmem:[%s1616_s1 + $0x8] sm:$0xff]  ;;  %v47_v13 = vld [vmem:[%s1616_s1 + $0x98] sm:$0xff] }
   0x3   :  { %v76_v5 = vld [vmem:[%s1616_s1 + $0x180] sm:$0xff]  ;;  %v77_v6 = vld [vmem:[%s1616_s1 + $0x188] sm:$0xff]  ;;  %v965_v7 = vpack.c.bf16 %v29_v4, %v28_v2  ;;  %v30_v14 = vld [vmem:[%s1616_s1 + $0x10] sm:$0xff]  ;;  %v967_v16 = vpack.c.bf16 %v47_v13, %v46_v11 }
   0x4   :  { %v995_v8 = vpack.c.bf16 %v77_v6, %v76_v5  ;;  %v60_v9 = vld [vmem:[%s1616_s1 + $0x100] sm:$0xff]  ;;  %v61_v10 = vld [vmem:[%s1616_s1 + $0x108] sm:$0xff]  ;;  %964 = vmatprep.subr.bf16.mxu0 %v963_v3  ;;  %v31_v15 = vld [vmem:[%s1616_s1 + $0x18] sm:$0xff] }
   0x5   :  { %v997_v12 = vpack.c.bf16 %v61_v10, %v60_v9  ;;  %966 = vmatpush3.bf16.msra.mxu0 %v965_v7  ;;  %v969_v17 = vpack.c.bf16 %v31_v15, %v30_v14  ;;  %v78_v18 = vld [vmem:[%s1616_s1 + $0x190] sm:$0xff]  ;;  %v79_v19 = vld [vmem:[%s1616_s1 + $0x198] sm:$0xff]  ;;  %v48_v23 = vld [vmem:[%s1616_s1 + $0xa0] sm:$0xff] }
   0x6   :  { %996 = vmatprep.subr.bf16.mxu1 %v995_v8  ;;  %v62_v20 = vld [vmem:[%s1616_s1 + $0x110] sm:$0xff]  ;;  %v999_v21 = vpack.c.bf16 %v79_v19, %v78_v18  ;;  %v63_v22 = vld [vmem:[%s1616_s1 + $0x118] sm:$0xff]  ;;  %v49_v24 = vld [vmem:[%s1616_s1 + $0xa8] sm:$0xff]  ;;  %968 = vmatprep.subr.bf16.mxu0 %v967_v16 }
   0x7   :  { %998 = vmatpush3.bf16.msra.mxu1 %v997_v12  ;;  %v1001_v25 = vpack.c.bf16 %v63_v22, %v62_v20  ;;  %v971_v26 = vpack.c.bf16 %v49_v24, %v48_v23  ;;  %v32_v27 = vld [vmem:[%s1616_s1 + $0x20] sm:$0xff]  ;;  %v33_v28 = vld [vmem:[%s1616_s1 + $0x28] sm:$0xff]  ;;  %v50_v35 = vld [vmem:[%s1616_s1 + $0xb0] sm:$0xff] }
   0x8   :  { %v80_v29 = vld [vmem:[%s1616_s1 + $0x1a0] sm:$0xff]  ;;  %1000 = vmatprep.subr.bf16.mxu1 %v999_v21  ;;  %v81_v30 = vld [vmem:[%s1616_s1 + $0x1a8] sm:$0xff]  ;;  %v973_v33 = vpack.c.bf16 %v33_v28, %v32_v27  ;;  %v51_v36 = vld [vmem:[%s1616_s1 + $0xb8] sm:$0xff] }
   0x9   :  { %v64_v31 = vld [vmem:[%s1616_s1 + $0x120] sm:$0xff]  ;;  %v65_v32 = vld [vmem:[%s1616_s1 + $0x128] sm:$0xff]  ;;  %970 = vmatpush3.bf16.msra.mxu0 %v969_v17  ;;  %v1003_v34 = vpack.c.bf16 %v81_v30, %v80_v29  ;;  %v34_v37 = vld [vmem:[%s1616_s1 + $0x30] sm:$0xff]  ;;  %v975_v39 = vpack.c.bf16 %v51_v36, %v50_v35 }
   0xa   :  { %972 = vmatprep.subr.bf16.mxu0 %v971_v26  ;;  %v1005_v38 = vpack.c.bf16 %v65_v32, %v64_v31  ;;  %v35_v40 = vld [vmem:[%s1616_s1 + $0x38] sm:$0xff]  ;;  %v82_v41 = vld [vmem:[%s1616_s1 + $0x1b0] sm:$0xff]  ;;  %v52_v46 = vld [vmem:[%s1616_s1 + $0xc0] sm:$0xff] }
   0xb   :  { %1002 = vmatpush3.bf16.msra.mxu1 %v1001_v25  ;;  %v83_v42 = vld [vmem:[%s1616_s1 + $0x1b8] sm:$0xff]  ;;  %v66_v44 = vld [vmem:[%s1616_s1 + $0x130] sm:$0xff]  ;;  %v53_v47 = vld [vmem:[%s1616_s1 + $0xc8] sm:$0xff]  ;;  %v977_v48 = vpack.c.bf16 %v35_v40, %v34_v37 }
   0xc   :  { %1004 = vmatprep.subr.bf16.mxu1 %v1003_v34  ;;  %v1007_v43 = vpack.c.bf16 %v83_v42, %v82_v41  ;;  %v67_v45 = vld [vmem:[%s1616_s1 + $0x138] sm:$0xff]  ;;  %v84_v49 = vld [vmem:[%s1616_s1 + $0x1c0] sm:$0xff]  ;;  %v85_v50 = vld [vmem:[%s1616_s1 + $0x1c8] sm:$0xff]  ;;  %v979_v52 = vpack.c.bf16 %v53_v47, %v52_v46 }
   0xd   :  { %974 = vmatpush3.bf16.msra.mxu0 %v973_v33  ;;  %v1009_v51 = vpack.c.bf16 %v67_v45, %v66_v44  ;;  %v36_v53 = vld [vmem:[%s1616_s1 + $0x40] sm:$0xff]  ;;  %v37_v54 = vld [vmem:[%s1616_s1 + $0x48] sm:$0xff]  ;;  %v1011_v56 = vpack.c.bf16 %v85_v50, %v84_v49  ;;  %v54_v58 = vld [vmem:[%s1616_s1 + $0xd0] sm:$0xff]  ;;  %v1148_v50 = vmov 0.0|0.0  }
   0xe   :  { %976 = vmatprep.subr.bf16.mxu0 %v975_v39  ;;  %v68_v55 = vld [vmem:[%s1616_s1 + $0x140] sm:$0xff]  ;;  %v69_v57 = vld [vmem:[%s1616_s1 + $0x148] sm:$0xff]  ;;  %v55_v59 = vld [vmem:[%s1616_s1 + $0xd8] sm:$0xff]  ;;  %v981_v62 = vpack.c.bf16 %v37_v54, %v36_v53 }
   0xf   :  { %1006 = vmatpush3.bf16.msra.mxu1 %v1005_v38  ;;  %v86_v60 = vld [vmem:[%s1616_s1 + $0x1d0] sm:$0xff]  ;;  %v87_v61 = vld [vmem:[%s1616_s1 + $0x1d8] sm:$0xff]  ;;  %v1013_v63 = vpack.c.bf16 %v69_v57, %v68_v55  ;;  %v983_v0 = vpack.c.bf16 %v55_v59, %v54_v58  ;;  %v56_v6 = vld [vmem:[%s1616_s1 + $0xe0] sm:$0xff] }
  0x10   :  { %1008 = vmatprep.subr.bf16.mxu1 %v1007_v43  ;;  %v38_v1 = vld [vmem:[%s1616_s1 + $0x50] sm:$0xff]  ;;  %v39_v2 = vld [vmem:[%s1616_s1 + $0x58] sm:$0xff]  ;;  %v1015_v4 = vpack.c.bf16 %v87_v61, %v86_v60  ;;  %v57_v7 = vld [vmem:[%s1616_s1 + $0xe8] sm:$0xff] }
  0x11   :  { %978 = vmatpush3.bf16.msra.mxu0 %v977_v48  ;;  %v70_v3 = vld [vmem:[%s1616_s1 + $0x150] sm:$0xff]  ;;  %v71_v5 = vld [vmem:[%s1616_s1 + $0x158] sm:$0xff]  ;;  %v88_v8 = vld [vmem:[%s1616_s1 + $0x1e0] sm:$0xff]  ;;  %v985_v10 = vpack.c.bf16 %v39_v2, %v38_v1  ;;  %v987_v14 = vpack.c.bf16 %v57_v7, %v56_v6 }
  0x12   :  { %980 = vmatprep.subr.bf16.mxu0 %v979_v52  ;;  %v89_v9 = vld [vmem:[%s1616_s1 + $0x1e8] sm:$0xff]  ;;  %v40_v11 = vld [vmem:[%s1616_s1 + $0x60] sm:$0xff]  ;;  %v1017_v13 = vpack.c.bf16 %v71_v5, %v70_v3  ;;  %v58_v19 = vld [vmem:[%s1616_s1 + $0xf0] sm:$0xff] }
  0x13   :  { %1010 = vmatpush3.bf16.msra.mxu1 %v1009_v51  ;;  %v22_v12 = vld [vmem:[%s1615_s0 + $0x8] sm:$0xff]  ;;  %v72_v16 = vld [vmem:[%s1616_s1 + $0x160] sm:$0xff]  ;;  %v1019_v18 = vpack.c.bf16 %v89_v9, %v88_v8  ;;  %v59_v20 = vld [vmem:[%s1616_s1 + $0xf8] sm:$0xff] }
  0x14   :  { %1012 = vmatprep.subr.bf16.mxu1 %v1011_v56  ;;  %v41_v15 = vld [vmem:[%s1616_s1 + $0x68] sm:$0xff]  ;;  %201 = vmatprep.mubr.f32.mxu0 %v22_v12  ;;  %v24_v21 = vld [vmem:[%s1615_s0 + $0x18] sm:$0xff]  ;;  %v90_v22 = vld [vmem:[%s1616_s1 + $0x1f0] sm:$0xff]  ;;  %v991_v26 = vpack.c.bf16 %v59_v20, %v58_v19 }
  0x15   :  { %982 = vmatpush3.bf16.msra.mxu0 %v981_v62  ;;  %v73_v17 = vld [vmem:[%s1616_s1 + $0x168] sm:$0xff]  ;;  %v91_v23 = vld [vmem:[%s1616_s1 + $0x1f8] sm:$0xff]  ;;  %271 = vmatprep.mubr.f32.mxu1 %v24_v21  ;;  %v989_v24 = vpack.c.bf16 %v41_v15, %v40_v11  ;;  %v42_v27 = vld [vmem:[%s1616_s1 + $0x70] sm:$0xff] }
  0x16   :  { %984 = vmatprep.subr.bf16.mxu0 %v983_v0  ;;  %v1021_v25 = vpack.c.bf16 %v73_v17, %v72_v16  ;;  %v43_v28 = vld [vmem:[%s1616_s1 + $0x78] sm:$0xff]  ;;  %v74_v29 = vld [vmem:[%s1616_s1 + $0x170] sm:$0xff]  ;;  %v1023_v30 = vpack.c.bf16 %v91_v23, %v90_v22  ;;  %v108_v32 = vld [vmem:[%s1616_s1 + $0x280] sm:$0xff] }
  0x17   :  { %1014 = vmatpush3.bf16.msra.mxu1 %v1013_v63  ;;  %v75_v31 = vld [vmem:[%s1616_s1 + $0x178] sm:$0xff]  ;;  %v109_v33 = vld [vmem:[%s1616_s1 + $0x288] sm:$0xff]  ;;  %v993_v34 = vpack.c.bf16 %v43_v28, %v42_v27  ;;  %v92_v37 = vld [vmem:[%s1616_s1 + $0x200] sm:$0xff] }
  0x18   :  { %1016 = vmatprep.subr.bf16.mxu1 %v1015_v4  ;;  %v1025_v35 = vpack.c.bf16 %v75_v31, %v74_v29  ;;  %v1027_v36 = vpack.c.bf16 %v109_v33, %v108_v32  ;;  %v93_v38 = vld [vmem:[%s1616_s1 + $0x208] sm:$0xff]  ;;  %v110_v39 = vld [vmem:[%s1616_s1 + $0x290] sm:$0xff]  ;;  %v111_v40 = vld [vmem:[%s1616_s1 + $0x298] sm:$0xff] }
  0x19   :  { %986 = vmatpush3.bf16.msra.mxu0 %v985_v10  ;;  %v21_v41 = vld [vmem:[%s1615_s0] sm:$0xff]  ;;  %v1029_v42 = vpack.c.bf16 %v93_v38, %v92_v37  ;;  %v23_v43 = vld [vmem:[%s1615_s0 + $0x10] sm:$0xff]  ;;  %v1031_v45 = vpack.c.bf16 %v111_v40, %v110_v39  ;;  %v95_v46 = vld [vmem:[%s1616_s1 + $0x218] sm:$0xff] }
  0x1a   :  { %988 = vmatprep.subr.bf16.mxu0 %v987_v14  ;;  %v94_v44 = vld [vmem:[%s1616_s1 + $0x210] sm:$0xff]  ;;  %v112_v47 = vld [vmem:[%s1616_s1 + $0x2a0] sm:$0xff]  ;;  %v113_v48 = vld [vmem:[%s1616_s1 + $0x2a8] sm:$0xff] }
  0x1b   :  { %1018 = vmatpush3.bf16.msra.mxu1 %v1017_v13  ;;  %v26_v49 = vld [vmem:[%s1615_s0 + $0x28] sm:$0xff]  ;;  %v124_v51 = vld [vmem:[%s1616_s1 + $0x300] sm:$0xff] }
  0x1c   :  { %1020 = vmatprep.subr.bf16.mxu1 %v1019_v18  ;;  %v125_v52 = vld [vmem:[%s1616_s1 + $0x308] sm:$0xff] }
  0x1d   :  { %990 = vmatpush3.bf16.msra.mxu0 %v989_v24  ;;  %v1060_v53 = vpack.c.bf16 %v125_v52, %v124_v51 }
  0x1e   :  { %992 = vmatprep.subr.bf16.mxu0 %v991_v26 }
  0x1f   :  { %1022 = vmatpush3.bf16.msra.mxu1 %v1021_v25 }
  0x20   :  { %1024 = vmatprep.subr.bf16.mxu1 %v1023_v30 }
  0x21   :  { %994 = vmatpush3.bf16.msra.mxu0 %v993_v34 }
  0x22   :  { %1028 = vmatprep.subr.bf16.mxu0 %v1027_v36 }
  0x23   :  { %1026 = vmatpush3.bf16.msra.mxu1 %v1025_v35 }
  0x24   :  { %1059 = vmatprep.subr.bf16.mxu1 %v1148_v50  ;;  %202 = vmatmul.mubr.f32.vlgmr.msra.gmra.mrb[0].mxu0 %v21_v41 }
  0x25   :  { %10 = vsyncpa [#allocation3], 0  ;;  %1030 = vmatpush3.bf16.msra.mxu0 %v1029_v42  ;;  %v1033_v54 = vpack.c.bf16 %v95_v46, %v94_v44  ;;  %v1035_v55 = vpack.c.bf16 %v113_v48, %v112_v47  ;;  %v96_v56 = vld [vmem:[%s1616_s1 + $0x220] sm:$0xff]  ;;  %v97_v57 = vld [vmem:[%s1616_s1 + $0x228] sm:$0xff]  ;;  %341 = vmatprep.mubr.f32.mxu0 %v26_v49  ;;  %vm1149_vm0 = vmmov 0   ;;  %v1150_v60 = vmov 0.0  }
  0x26   :  { %272 = vmatmul.mubr.f32.vlgmr.msra.gmra.mrb[0].mxu1 %v23_v43  ;;  %1032 = vmatprep.subr.bf16.mxu0 %v1031_v45  ;;  %v114_v58 = vld [vmem:[%s1616_s1 + $0x2b0] sm:$0xff]  ;;  %v115_v59 = vld [vmem:[%s1616_s1 + $0x2b8] sm:$0xff]  ;;  %vm133_vm1 = vcmask 130048   ;;  %v1037_v62 = vpack.c.bf16 %v97_v57, %v96_v56  ;;  %v116_v2 = vld [vmem:[%s1616_s1 + $0x2c0] sm:$0xff]  ;;  %vm483_vm2 = vcmask 261120  }
  0x27   :  { %1061 = vmatpush3.bf16.msra.mxu1 %v1060_v53  ;;  %949 = vmatprep.mubr.msk.f32.mxu1 %vm1149_vm0, %v1150_v60  ;;  %v27_v61 = vld [vmem:[%s1615_s0 + $0x30] sm:$0xff]  ;;  %v1039_v63 = vpack.c.bf16 %v115_v59, %v114_v58  ;;  %v99_v1 = vld [vmem:[%s1616_s1 + $0x238] sm:$0xff]  ;;  %v117_v3 = vld [vmem:[%s1616_s1 + $0x2c8] sm:$0xff] }
  0x28   :  { %v98_v0 = vld [vmem:[%s1616_s1 + $0x230] sm:$0xff]  ;;  %v1043_v5 = vpack.c.bf16 %v117_v3, %v116_v2  ;;  %v100_v6 = vld [vmem:[%s1616_s1 + $0x240] sm:$0xff]  ;;  %v101_v7 = vld [vmem:[%s1616_s1 + $0x248] sm:$0xff] }
  0x29   :  { %1034 = vmatpush3.bf16.msra.mxu0 %v1033_v54  ;;  %v1041_v4 = vpack.c.bf16 %v99_v1, %v98_v0  ;;  %v118_v8 = vld [vmem:[%s1616_s1 + $0x2d0] sm:$0xff]  ;;  %v119_v9 = vld [vmem:[%s1616_s1 + $0x2d8] sm:$0xff]  ;;  %v1045_v10 = vpack.c.bf16 %v101_v7, %v100_v6  ;;  %v120_v14 = vld [vmem:[%s1616_s1 + $0x2e0] sm:$0xff] }
  0x2a   :  { %1036 = vmatprep.subr.bf16.mxu0 %v1035_v55  ;;  %950 = vmatmul.mubr.msk.f32.vlgmr.msra.gmra.mrb[2].mxu1 %vm133_vm1, %v27_v61  ;;  %v1047_v11 = vpack.c.bf16 %v119_v9, %v118_v8  ;;  %v102_v12 = vld [vmem:[%s1616_s1 + $0x250] sm:$0xff]  ;;  %v103_v13 = vld [vmem:[%s1616_s1 + $0x258] sm:$0xff]  ;;  %v121_v15 = vld [vmem:[%s1616_s1 + $0x2e8] sm:$0xff] }
  0x2b   :  { %551 = vmatprep.mubr.f32.mxu1 %v1150_v60  ;;  %v1049_v16 = vpack.c.bf16 %v103_v13, %v102_v12  ;;  %v1051_v17 = vpack.c.bf16 %v121_v15, %v120_v14  ;;  %v104_v18 = vld [vmem:[%s1616_s1 + $0x260] sm:$0xff]  ;;  %v105_v19 = vld [vmem:[%s1616_s1 + $0x268] sm:$0xff]  ;;  %v122_v20 = vld [vmem:[%s1616_s1 + $0x2f0] sm:$0xff] }
  0x2c   :  { %v123_v21 = vld [vmem:[%s1616_s1 + $0x2f8] sm:$0xff]  ;;  %v1053_v22 = vpack.c.bf16 %v105_v19, %v104_v18  ;;  %v106_v24 = vld [vmem:[%s1616_s1 + $0x270] sm:$0xff]  ;;  %v25_v27 = vld [vmem:[%s1615_s0 + $0x20] sm:$0xff] }
  0x2d   :  { %1038 = vmatpush3.bf16.msra.mxu0 %v1037_v62  ;;  %v1055_v23 = vpack.c.bf16 %v123_v21, %v122_v20  ;;  %v107_v25 = vld [vmem:[%s1616_s1 + $0x278] sm:$0xff]  ;;  %v419_v28 = vld [vmem:[%s1618_s3 + $0x8] sm:$0xff]  ;;  %v426_v29 = vld [vmem:[%s1618_s3 + $0x40] sm:$0xff] }
  0x2e   :  { %1040 = vmatprep.subr.bf16.mxu0 %v1039_v63  ;;  %v1057_v26 = vpack.c.bf16 %v107_v25, %v106_v24  ;;  %v1062_v30 = vpack.c.bf16 %v426_v29, %v419_v28  ;;  %v418_v31 = vld [vmem:[%s1618_s3] sm:$0xff]  ;;  %v425_v32 = vld [vmem:[%s1618_s3 + $0x38] sm:$0xff]  ;;  %v440_v35 = vld [vmem:[%s1618_s3 + $0xb0] sm:$0xff]  ;;  %v448_v25 = vlaneseq }
  0x2f   :  { %v1064_v33 = vpack.c.bf16 %v425_v32, %v418_v31  ;;  %v433_v34 = vld [vmem:[%s1618_s3 + $0x78] sm:$0xff]  ;;  %v432_v37 = vld [vmem:[%s1618_s3 + $0x70] sm:$0xff]  ;;  %v439_v38 = vld [vmem:[%s1618_s3 + $0xa8] sm:$0xff] }
  0x30   :  { %1063 = vmatprep.subr.bf16.mxu1 %v1062_v30  ;;  %v1066_v36 = vpack.c.bf16 %v440_v35, %v433_v34  ;;  %v1068_v39 = vpack.c.bf16 %v439_v38, %v432_v37  ;;  %v421_v40 = vld [vmem:[%s1618_s3 + $0x18] sm:$0xff]  ;;  %v428_v41 = vld [vmem:[%s1618_s3 + $0x50] sm:$0xff]  ;;  %v826_v44 = vld [vmem:[%s1617_s2] ss:$0 sm:$0xff] }
  0x31   :  { %1042 = vmatpush3.bf16.msra.mxu0 %v1041_v4  ;;  %1065 = vmatpush1.bf16.msra.mxu1 %v1064_v33  ;;  %v1070_v42 = vpack.c.bf16 %v428_v41, %v421_v40  ;;  %v420_v59 = vld [vmem:[%s1618_s3 + $0x10] sm:$0xff]  ;;  %v427_v61 = vld [vmem:[%s1618_s3 + $0x48] sm:$0xff]  ;;  %v442_v63 = vld [vmem:[%s1618_s3 + $0xc0] sm:$0xff] }
  0x32   :  { %1044 = vmatprep.subr.bf16.mxu0 %v1043_v5  ;;  %1067 = vmatprep.subr.bf16.mxu1 %v1066_v36  ;;  %v435_v62 = vld [vmem:[%s1618_s3 + $0x88] sm:$0xff]  ;;  %v1072_v1 = vpack.c.bf16 %v427_v61, %v420_v59  ;;  %v434_v4 = vld [vmem:[%s1618_s3 + $0x80] sm:$0xff]  ;;  %v441_v5 = vld [vmem:[%s1618_s3 + $0xb8] sm:$0xff] }
  0x33   :  { %v1074_v3 = vpack.c.bf16 %v442_v63, %v435_v62  ;;  %v423_v6 = vld [vmem:[%s1618_s3 + $0x28] sm:$0xff]  ;;  %v430_v7 = vld [vmem:[%s1618_s3 + $0x60] sm:$0xff]  ;;  %v1076_v8 = vpack.c.bf16 %v441_v5, %v434_v4  ;;  %v437_v12 = vld [vmem:[%s1618_s3 + $0x98] sm:$0xff] }
  0x34   :  { %v1078_v9 = vpack.c.bf16 %v430_v7, %v423_v6  ;;  %v444_v13 = vld [vmem:[%s1618_s3 + $0xd0] sm:$0xff]  ;;  %v431_v20 = vld [vmem:[%s1618_s3 + $0x68] sm:$0xff]  ;;  %v446_v28 = vld [vmem:[%s1619_s4] sm:$0x7f] }
  0x35   :  { %1046 = vmatpush3.bf16.msra.mxu0 %v1045_v10  ;;  %1069 = vmatpush1.bf16.msra.mxu1 %v1068_v39  ;;  %v422_v10 = vld [vmem:[%s1618_s3 + $0x20] sm:$0xff]  ;;  %v1082_v15 = vpack.c.bf16 %v444_v13, %v437_v12  ;;  %v424_v19 = vld [vmem:[%s1618_s3 + $0x30] sm:$0xff] }
  0x36   :  { %1048 = vmatprep.subr.bf16.mxu0 %v1047_v11  ;;  %1071 = vmatprep.subr.bf16.mxu1 %v1070_v42  ;;  %v429_v11 = vld [vmem:[%s1618_s3 + $0x58] sm:$0xff]  ;;  %v1087_v21 = vpack.c.bf16 %v431_v20, %v424_v19 }
  0x37   :  { %v1080_v14 = vpack.c.bf16 %v429_v11, %v422_v10 }
  0x39   :  { %1050 = vmatpush3.bf16.msra.mxu0 %v1049_v16  ;;  %v436_v16 = vld [vmem:[%s1618_s3 + $0x90] sm:$0xff] }
  0x3a   :  { %1052 = vmatprep.subr.bf16.mxu0 %v1051_v17  ;;  %v443_v17 = vld [vmem:[%s1618_s3 + $0xc8] sm:$0xff] }
  0x3b   :  { %v1084_v18 = vpack.c.bf16 %v443_v17, %v436_v16 }
  0x3d   :  { %1054 = vmatpush3.bf16.msra.mxu0 %v1053_v22  ;;  %v438_v22 = vld [vmem:[%s1618_s3 + $0xa0] sm:$0xff] }
  0x3e   :  { %1056 = vmatprep.subr.bf16.mxu0 %v1055_v23  ;;  %v445_v23 = vld [vmem:[%s1618_s3 + $0xd8] sm:$0xff]  ;;  %s1151_s3 = smov [#allocation2]  }
  0x3f   :  { %v1090_v24 = vpack.c.bf16 %v445_v23, %v438_v22  ;;  %s818_s4 = sshll.u32 %s1151_s3, 4  ;;  %s819_s4 = int_to_ptr.vmem [resolvable:$true] %s818_s4 }
  0x40   :  { %s1124_s7 = scalar_lea.vmem %s819_s4, 896  ;;  %p1129_p1 = scmp.lt.s32.totalorder %s819_s4, %s819_s4 }
  0x41   :  { %1058 = vmatpush3.bf16.msra.mxu0 %v1057_v26  ;;  %v449_v26 = vshrl.u32 %v448_v25, 7  ;;  %p1125_p0 = scmp.ne.s32.totalorder %s819_s4, %s1124_s7  ;;  %p1130_p2 = scmp.lt.s32.totalorder %s1124_s7, %s1124_s7 }
  0x43   :  { %v454_v29 = vsub.s32 1, %v449_v26  ;;  %v458_v35 = vsub.s32 2, %v449_v26  ;;  %v462_v36 = vsub.s32 3, %v449_v26  ;;  %v474_v59 = vsub.s32 6, %v449_v26  ;;  %p1131_p3 = por %p1130_p2, %p1129_p1 }
  0x44   :  { %342 = vmatmul.mubr.f32.vlgmr.msra.gmra.mrb[2].mxu0 %v25_v27  ;;  %v450_v27 = vsub.s32 0, %v449_v26 }
  0x45   :  { %v455_v31 = vrot.slane %v446_v28, %v454_v29  ;;  %v459_v39 = vrot.slane %v446_v28, %v458_v35  ;;  %v463_v41 = vrot.slane %v446_v28, %v462_v36  ;;  %v475_v4 = vrot.slane %v446_v28, %v474_v59  ;;  %p1132_p4 = pnand %p1131_p3, %p1125_p0 }
  0x46   :  { %v451_v30 = vrot.slane %v446_v28, %v450_v27 }
  0xf7   :  { %v864_v43 = vpop.f32.mrb[0].mxu0 }
  0xf8   :  { %v865_v45 = vpop.f32.mrb[1].mxu0 }
  0xf9   :  { %v899_v46 = vpop.f32.mrb[0].mxu1  ;;  %v866_v47 = vadd.f32 %v865_v45, %v864_v43  ;;  %v466_v45 = vsub.s32 4, %v449_v26 }
  0xfa   :  { %v900_v48 = vpop.f32.mrb[1].mxu1 }
  0xfb   :  { %v901_v49 = vadd.f32 %v900_v48, %v899_v46  ;;  %v204_v51 = vadd.f32 %v866_v47, %v826_v44  ;;  %v470_v47 = vsub.s32 5, %v449_v26 }
  0xfd   :  { %v274_v52 = vadd.f32 %v901_v49, %v204_v51  ;;  %v413_v53 = vpop.f32.mrb[2].mxu1 }
  0xfe   :  { %v951_v54 = vpop.f32.mrb[3].mxu1 }
  0xff   :  { %v471_v54 = vrot.slane %v446_v28, %v470_v47 }
 0x117   :  { %v934_v55 = vpop.f32.mrb[2].mxu0 }
 0x118   :  { %v935_v56 = vpop.f32.mrb[3].mxu0 }
 0x119   :  { %v936_v57 = vadd.f32 %v935_v56, %v934_v55 }
 0x11b   :  { %v344_v58 = vadd.f32 %v936_v57, %v274_v52  ;;  %v467_v52 = vrot.slane %v446_v28, %v466_v45 }
 0x11d   :  { %v414_v0 = vadd.f32 %v413_v53, %v344_v58 }
 0x11f   :  { %v417_v2 = vmax.f32 %v414_v0, 0.0 }
 0x121   :  { %828 = vmatmul.mubr.msk.f32.vlgmr.msra.gmra.mrb[4].mxu1 %vm483_vm2, %v417_v2 }
 0x122   :  { %1073 = vmatpush1.bf16.msra.mxu1 %v1072_v1  ;;  %622 = vmatprep.mubr.f32.mxu1 %v1150_v60 }
 0x123   :  { %1075 = vmatprep.subr.bf16.mxu1 %v1074_v3 }
 0x126   :  { %1077 = vmatpush1.bf16.msra.mxu1 %v1076_v8 }
 0x127   :  { %1079 = vmatprep.subr.bf16.mxu1 %v1078_v9 }
 0x129   :  { %829 = vmatmul.mubr.msk.f32.vlgmr.msra.gmra.mrb[6].mxu1 %vm483_vm2, %v417_v2 }
 0x12a   :  { %1081 = vmatpush1.bf16.msra.mxu1 %v1080_v14  ;;  %693 = vmatprep.mubr.f32.mxu1 %v1150_v60 }
 0x12b   :  { %1083 = vmatprep.subr.bf16.mxu1 %v1082_v15 }
 0x12e   :  { %1085 = vmatpush1.bf16.msra.mxu1 %v1084_v18 }
 0x12f   :  { %1086 = vmatprep.subr.bf16.mxu1 %v1148_v50 }
 0x131   :  { %830 = vmatmul.mubr.msk.f32.vlgmr.msra.gmra.mrb[8].mxu1 %vm483_vm2, %v417_v2 }
 0x132   :  { %1088 = vmatpush3.bf16.msra.mxu1 %v1087_v21  ;;  %960 = vmatprep.mubr.msk.f32.mxu1 %vm1149_vm0, %v1150_v60 }
 0x133   :  { %1089 = vmatprep.subr.bf16.mxu1 %v1148_v50 }
 0x136   :  { %1091 = vmatpush3.bf16.msra.mxu1 %v1090_v24 }
 0x139   :  { %961 = vmatmul.mubr.msk.f32.vlgmr.msra.gmra.mrb[10].mxu1 %vm483_vm2, %v417_v2 }
 0x1f4   :  { %v553_v32 = vpop.f32.mrb[4].mxu1 }
 0x1f5   :  { %v554_v33 = vadd.f32 %v553_v32, %v451_v30  ;;  %v555_v34 = vpop.f32.mrb[5].mxu1 }
 0x1f6   :  { %v556_v60 = vadd.f32 %v555_v34, %v455_v31 }
 0x1f7   :  { %v770_v50 = vsub.f32 0.0, %v554_v33 }
 0x1f8   :  { %v771_v37 = vsub.f32 0.0, %v556_v60 }
 0x1f9   :  { %v777_v38 = vmul.f32 1.442695, %v770_v50 }
 0x1fa   :  { %v779_v40 = vmul.f32 1.442695, %v771_v37 }
 0x1fb   :  { %1096 = vpow2.f32 %v777_v38 }
 0x1fc   :  { %1098 = vpow2.f32 %v779_v40  ;;  %v624_v42 = vpop.f32.mrb[6].mxu1 }
 0x1fd   :  { %v625_v43 = vadd.f32 %v624_v42, %v459_v39  ;;  %v626_v44 = vpop.f32.mrb[7].mxu1 }
 0x1fe   :  { %v627_v46 = vadd.f32 %v626_v44, %v463_v41 }
 0x1ff   :  { %v772_v48 = vsub.f32 0.0, %v625_v43 }
 0x200   :  { %v773_v49 = vsub.f32 0.0, %v627_v46 }
 0x201   :  { %v781_v51 = vmul.f32 1.442695, %v772_v48 }
 0x202   :  { %v783_v53 = vmul.f32 1.442695, %v773_v49 }
 0x203   :  { %1100 = vpow2.f32 %v781_v51 }
 0x204   :  { %1102 = vpow2.f32 %v783_v53  ;;  %v695_v55 = vpop.f32.mrb[8].mxu1 }
 0x205   :  { %v1097_v56 = vpop.eup %1096  ;;  %v696_v57 = vadd.f32 %v695_v55, %v467_v52  ;;  %v697_v58 = vpop.f32.mrb[9].mxu1 }
 0x206   :  { %v1099_v61 = vpop.eup %1098  ;;  %v791_v62 = vadd.f32 1.0, %v1097_v56  ;;  %v698_v63 = vadd.f32 %v697_v58, %v471_v54 }
 0x207   :  { %v792_v0 = vadd.f32 1.0, %v1099_v61  ;;  %v774_v1 = vsub.f32 0.0, %v696_v57 }
 0x208   :  { %1104 = vrcp.f32 %v791_v62  ;;  %v775_v2 = vsub.f32 0.0, %v698_v63 }
 0x209   :  { %1106 = vrcp.f32 %v792_v0  ;;  %v785_v3 = vmul.f32 1.442695, %v774_v1 }
 0x20a   :  { %v787_v5 = vmul.f32 1.442695, %v775_v2 }
 0x20b   :  { %1108 = vpow2.f32 %v785_v3 }
 0x20c   :  { %1110 = vpow2.f32 %v787_v5  ;;  %v766_v6 = vpop.f32.mrb[10].mxu1 }
 0x20d   :  { %v1101_v7 = vpop.eup %1100  ;;  %v767_v8 = vadd.f32 %v766_v6, %v475_v4  ;;  %v962_v9 = vpop.f32.mrb[11].mxu1 }
 0x20e   :  { %v1103_v10 = vpop.eup %1102  ;;  %v793_v11 = vadd.f32 1.0, %v1101_v7 }
 0x20f   :  { %v794_v12 = vadd.f32 1.0, %v1103_v10  ;;  %v776_v13 = vsub.f32 0.0, %v767_v8 }
 0x210   :  { %1112 = vrcp.f32 %v793_v11 }
 0x211   :  { %1114 = vrcp.f32 %v794_v12  ;;  %v789_v14 = vmul.f32 1.442695, %v776_v13 }
 0x212   :  { %v1105_v15 = vpop.eup %1104 }
 0x213   :  { %v1107_v16 = vpop.eup %1106  ;;  %805 = vst [vmem:[#allocation2] sm:$0xff] %v1105_v15  ;;  %1116 = vpow2.f32 %v789_v14 }
 0x214   :  { %806 = vst [vmem:[#allocation2 + $0x8] sm:$0xff] %v1107_v16 }
 0x215   :  { %v1109_v17 = vpop.eup %1108 }
 0x216   :  { %v1111_v18 = vpop.eup %1110  ;;  %v795_v19 = vadd.f32 1.0, %v1109_v17 }
 0x217   :  { %v796_v20 = vadd.f32 1.0, %v1111_v18 }
 0x218   :  { %1118 = vrcp.f32 %v795_v19 }
 0x219   :  { %1120 = vrcp.f32 %v796_v20 }
 0x21a   :  { %v1113_v21 = vpop.eup %1112 }
 0x21b   :  { %v1115_v22 = vpop.eup %1114  ;;  %807 = vst [vmem:[#allocation2 + $0x10] sm:$0xff] %v1113_v21 }
 0x21c   :  { %808 = vst [vmem:[#allocation2 + $0x18] sm:$0xff] %v1115_v22 }
 0x21d   :  { %v1117_v23 = vpop.eup %1116 }
 0x21e   :  { %v797_v24 = vadd.f32 1.0, %v1117_v23 }
 0x220   :  { %1122 = vrcp.f32 %v797_v24 }
 0x222   :  { %v1119_v25 = vpop.eup %1118 }
 0x223   :  { %v1121_v26 = vpop.eup %1120  ;;  %809 = vst [vmem:[#allocation2 + $0x20] sm:$0xff] %v1119_v25 }
 0x224   :  { %810 = vst [vmem:[#allocation2 + $0x28] sm:$0xff] %v1121_v26 }
 0x22a   :  { %v1123_v27 = vpop.eup %1122 }
 0x22b   :  { %811 = vst.msk [vmem:[#allocation2 + $0x30] sm:$0xff] %vm133_vm1, %v1123_v27 }
 0x22c   :  { %1135 = shalt.err (!%p1132_p4)
}
 0x22d   :  { %s1136_s9 = scalar_lea.hbm %s1620_s5, 896 }
 0x22e   :  { %p1137_p5 = scmp.ne.s32.totalorder %s1620_s5, %s1136_s9  ;;  %p1140_p6 = scmp.lt.u32.totalorder %s1136_s9, %s1620_s5 }
 0x230   :  { %p1142_p7 = pnand %p1140_p6, %p1137_p5 }
 0x232   :  { %1145 = shalt.err (!%p1142_p7)
}
 0x233   :  { %821 = dma.vmem_to_hbm [thread:$0]  %s819_s4, 896, %s1620_s5, [#allocation3]  }
 0x234   :  { %1146 = dma.done.wait [#allocation3], 896  }
 0x235   :  { %1147 = vsyncadd [#allocation3], 4294966400 }
 0x236   :  { %825 = vsyncpa [#allocation3], 1 }

</bundles_post_ra>
